<compile_context>
chip_gen: v5e
topology: v5e:2x2
jax: 0.10.0
libtpu: 0.0.40
codegen_flags: <defaults>
</compile_context>

<pallas_src>
import functools

import jax
import jax.numpy as jnp
from jax.experimental import pallas as pl
from jax.experimental.pallas import tpu as pltpu

LANE = 128
_TARGET_BLOCK_BYTES = 2 * 1024 * 1024  # ~2 MiB per block per operand


def _swish_kernel(x_ref, o_ref):
    x = x_ref[...]
    o_ref[...] = (x * jax.nn.sigmoid(x)).astype(o_ref.dtype)


def _round_up(a: int, b: int) -> int:
    return ((a + b - 1) // b) * b


@jax.jit
def swish_auto(x: jax.Array) -> jax.Array:
    """Pallas TPU implementation of SwishAuto.forward (x * sigmoid(x))."""
    orig_shape = x.shape
    dtype = x.dtype
    n = x.size

    itemsize = jnp.dtype(dtype).itemsize
    # dtype-aware sublane packing: f32 -> 8, bf16/f16 -> 16, int8/fp8 -> 32
    sublane = {4: 8, 2: 16, 1: 32}.get(itemsize, 8)

    # Pad the flat length only up to one lane row (128 elements), and only if
    # needed.  For the common aligned case this is a free reshape (no extra
    # HBM pass).
    n_pad = _round_up(n, LANE)
    flat = x.reshape(-1)
    padded = n_pad != n
    if padded:
        flat = jnp.pad(flat, (0, n_pad - n))

    rows = n_pad // LANE
    x2d = flat.reshape(rows, LANE)

    # Target ~2 MiB blocks, rounded to the sublane multiple.
    target_rows = max(
        sublane, (_TARGET_BLOCK_BYTES // (LANE * itemsize)) // sublane * sublane
    )

    if rows <= target_rows:
        # Small/medium input: try to split into ~2 blocks so both v7x
        # TensorCores get work; fall back to a single full-array block when
        # rows is tiny or not sublane-aligned (full-array block is always a
        # legal block shape).
        if rows >= 2 * sublane and rows % sublane == 0:
            tile_rows = _round_up(pl.cdiv(rows, 2), sublane)
        else:
            tile_rows = rows
    else:
        tile_rows = target_rows

    grid = (pl.cdiv(rows, tile_rows),)

    y2d = pl.pallas_call(
        _swish_kernel,
        out_shape=jax.ShapeDtypeStruct((rows, LANE), dtype),
        grid_spec=pltpu.PrefetchScalarGridSpec(
            num_scalar_prefetch=0,
            grid=grid,
            in_specs=[pl.BlockSpec((tile_rows, LANE), lambda i: (i, 0))],
            out_specs=pl.BlockSpec((tile_rows, LANE), lambda i: (i, 0)),
        ),
        compiler_params=pltpu.CompilerParams(
            dimension_semantics=("parallel",),
        ),
    )(x2d)

    y_flat = y2d.reshape(-1)
    if padded:
        y_flat = y_flat[:n]
    return y_flat.reshape(orig_shape)


if __name__ == "__main__":
    key = jax.random.PRNGKey(0)
    # NCHW input, consistent with typical conv-activation usage of SwishAuto
    x = jax.random.normal(key, (2, 4, 16, 16), dtype=jnp.float32)

    y = swish_auto(x)
    jax.block_until_ready(y)

    # reference check in plain JAX
    y_ref = x * jax.nn.sigmoid(x)
    assert y.shape == x.shape and y.dtype == x.dtype
    assert jnp.max(jnp.abs(y - y_ref)) < 1e-6

    # quick check of an unaligned shape (exercises the pad/unpad path)
    x2 = jax.random.normal(jax.random.PRNGKey(1), (3, 5, 7), dtype=jnp.float32)
    y2 = swish_auto(x2)
    jax.block_until_ready(y2)
    assert jnp.max(jnp.abs(y2 - x2 * jax.nn.sigmoid(x2))) < 1e-6

    print("KERNEL_OK")
</pallas_src>

<mosaic_0001>
module attributes {stable_mosaic.version = 11 : i64} {
  func.func @_swish_kernel(%arg0: i32, %arg1: memref<8x128xf32, #tpu.memory_space<vmem>>, %arg2: memref<8x128xf32, #tpu.memory_space<vmem>>) attributes {dimension_semantics = [#tpu.dimension_semantics<parallel>], iteration_bounds = array<i64: 2>, scalar_prefetch = 0 : i64, scratch_operands = 0 : i64, tpu.core_type = #tpu.core_type<tc>, window_params = [{transform_indices = @transform_0, window_bounds = array<i64: 8, 128>}, {transform_indices = @transform_1, window_bounds = array<i64: 8, 128>}]} {
    %c0 = arith.constant 0 : index
    %c0_0 = arith.constant 0 : index
    %0 = vector.load %arg1[%c0, %c0_0] : memref<8x128xf32, #tpu.memory_space<vmem>>, vector<8x128xf32>
    %1 = arith.negf %0 : vector<8x128xf32>
    %2 = math.exp %1 : vector<8x128xf32>
    %cst = arith.constant 1.000000e+00 : f32
    %3 = vector.broadcast %cst : f32 to vector<8x128xf32>
    %4 = arith.addf %3, %2 : vector<8x128xf32>
    %5 = arith.divf %3, %4 : vector<8x128xf32>
    %6 = arith.mulf %0, %5 : vector<8x128xf32>
    %c0_1 = arith.constant 0 : index
    %c0_2 = arith.constant 0 : index
    %7 = vector.load %arg2[%c0_1, %c0_2] : memref<8x128xf32, #tpu.memory_space<vmem>>, vector<8x128xf32>
    tpu.vector_store %arg2[%c0_1, %c0_2], %6 {strides = array<i32>} : memref<8x128xf32, #tpu.memory_space<vmem>>, vector<8x128xf32>,
    return
  }
  func.func @transform_0(%arg0: i32) -> (i32, i32) {
    %c0_i32 = arith.constant 0 : i32
    %c0_i32_0 = arith.constant 0 : i32
    return %arg0, %c0_i32 : i32, i32
  }
  func.func @transform_1(%arg0: i32) -> (i32, i32) {
    %c0_i32 = arith.constant 0 : i32
    %c0_i32_0 = arith.constant 0 : i32
    return %arg0, %c0_i32 : i32, i32
  }
}

</mosaic_0001>

<bundles_post_ra>
// kernel: swish_auto.1
= control target key start
LH: loop header
LB: loop body
LE: loop exit
PB: predicated region body
PF: predicated region fallthrough
CT: control target
= control target key end

     0   :  { %s227_s6 = smov 0   ;;  %s244_s0 = inlined_call_operand.vmem [shape: f32[16,128], index: 0, kind: input, shape index: {}]   ;;  %s245_s1 = inlined_call_operand.vmem [shape: f32[16,128], index: 1, kind: output, shape index: {}]  }
   0x1 LB: > { %s187_s7 = sadd.s32 4294967295, %s215_s6   ;;  %p191_p0 = scmp.ge.s32.totalorder %s215_s6, 1  ;;  %s215_s6 = sphi %s227_s6, %s11_s6  }
   0x2   : > { %p86_p1 = scmp.lt.s32.totalorder %s215_s6, 3 }
   0x4   : > { %p87_p2 = pnand %p191_p0, %p86_p1 }
   0x5   : > { %p104_p3 = scmp.lt.s32.totalorder (!%p87_p2), %s187_s7, 1 }
   0x6   : > { %90 = sbr.rel (%p87_p2) target bundleno = 46 (0x2e), region = 24 }
   0xb   : > { %s247_s7 = smov (!%p104_p3, %s187_s7), 1 }
   0xc   : > { %s192_s8 = sshll.u32 %s247_s7, 3 }
   0xd   : > { %s107_s11 = scalar_lea.vmem %s244_s0, %s192_s8  ;;  %s111_s14 = scalar_lea.vmem %s245_s1, %s192_s8 }
   0xe   : > { %v112_v0 = vld [vmem:[%s107_s11] sm:$0xff] }
   0xf   : > { %v194_v1 = vmul.f32 -1.442695, %v112_v0 }
  0x11   : > { %205 = vpow2.f32 %v194_v1 }
  0x17   : > { %v206_v2 = vpop.eup %205 }
  0x18   : > { %v116_v3 = vadd.f32 1.0, %v206_v2 }
  0x1a   : > { %207 = vrcp.f32 %v116_v3  ;;  %v128_v6 = vand.u32 2147483648, %v116_v3  ;;  %vm122_vm0 = vweird.f32 %v116_v3  ;;  %v126_v8 = vand.u32 2147483647, %v116_v3 }
  0x1c   : > { %v129_v10 = vor.u32 1.1754944e-38, %v128_v6  ;;  %vm127_vm3 = vcmp.eq.f32.partialorder %v126_v8, 8.507059e+37 }
  0x20   : > { %v208_v4 = vpop.eup %207 }
  0x21   : > { %v118_v5 = vmul.f32 %v208_v4, %v116_v3  ;;  %vm123_vm1 = vweird.f32 %v208_v4 }
  0x22   : > { %vm124_vm2 = vmor %vm122_vm0, %vm123_vm1 }
  0x23   : > { %v119_v7 = vsub.f32 1.0, %v118_v5 }
  0x25   : > { %v120_v9 = vmul.f32 %v208_v4, %v119_v7 }
  0x27   : > { %v121_v11 = vadd.f32 %v208_v4, %v120_v9 }
  0x29   : > { %v125_v12 = vsel %vm124_vm2, %v208_v4, %v121_v11 }
  0x2a   : > { %v130_v13 = vsel %vm127_vm3, %v129_v10, %v125_v12 }
  0x2b   : > { %v132_v14 = vmul.f32 %v130_v13, %v112_v0 }
  0x2d   : > { %133 = vst [vmem:[%s111_s14] sm:$0xff] %v132_v14 }
  0x2e PF: > { %s11_s6 = sadd.s32 1, %s215_s6  }
  0x2f   : > { %p8_p4 = scmp.ge.s32.totalorder %s11_s6, 4  }
  0x31   :  { %10 = sbr.rel (!%p8_p4) target bundleno = 1 (0x1), region = 54 }

</bundles_post_ra>
